<compile_context>
chip_gen: v7x
topology: tpu7x:2x2x1
jax: 0.10.0
libtpu: 0.0.40
codegen_flags: <defaults>
</compile_context>

<pallas_src>
import jax
import jax.numpy as jnp
from jax.experimental import pallas as pl
from jax.experimental.pallas import tpu as pltpu


def tag_embedding_kernel(tags_ref, probs_ref, table_t_ref, out_ref):
    # tags_ref:    (1, T)  int32   -- lane-major tag ids for this row tile
    # probs_ref:   (1, T)  float32 -- lane-major probabilities for this row tile
    # table_t_ref: (D, V)  float32 -- transposed embedding table (resident in VMEM)
    # out_ref:     (D, T)  float32 -- transposed output tile (lane-dense stores)
    d, v = table_t_ref.shape
    t = tags_ref.shape[1]

    tags = tags_ref[...]                                       # (1, T)
    iota_v = jax.lax.broadcasted_iota(jnp.int32, (v, t), 0)    # (V, T)
    onehot_t = (iota_v == tags).astype(table_t_ref.dtype)      # (V, T) one-hot cols

    # Gather via one-hot matmul on the MXU (transposed layout keeps lanes dense).
    emb_t = jnp.dot(table_t_ref[...], onehot_t,
                    preferred_element_type=jnp.float32)        # (D, T)

    # Fused scaling: emb * probs (probs broadcast over the D sublanes).
    out_ref[...] = (emb_t * probs_ref[...]).astype(out_ref.dtype)


def _pick_tile_n():
    """256 rows/tile on v6e/v7x (256-wide MXU), 128 on v5e (128-wide MXU)."""
    try:
        kind = jax.devices()[0].device_kind.lower()
        if "v5 lite" in kind or "v5e" in kind or "v5litepod" in kind:
            return 128
    except Exception:
        pass
    return 256


def tag_embedding_forward(tags, probs, table, tile_n=None):
    """tags: (B, S) int, probs: (B, S) float, table: (V, D) float -> (B, S, D)."""
    B, S = tags.shape
    V, D = table.shape
    N = B * S

    if tile_n is None:
        tile_n = _pick_tile_n()
    grid_n = pl.cdiv(N, tile_n)
    n_pad = grid_n * tile_n

    tags_flat = tags.reshape(N).astype(jnp.int32)
    probs_flat = probs.reshape(N).astype(jnp.float32)
    if n_pad != N:
        # Padded rows are computed and discarded after the call (probs padded
        # with 0, so they are zero anyway).
        tags_flat = jnp.pad(tags_flat, (0, n_pad - N))
        probs_flat = jnp.pad(probs_flat, (0, n_pad - N))

    tags_lane = tags_flat.reshape(1, n_pad)      # lane-major index layout
    probs_lane = probs_flat.reshape(1, n_pad)    # lane-major scale layout
    table_t = table.astype(jnp.float32).T        # (D, V), transposed once outside

    out_t = pl.pallas_call(
        tag_embedding_kernel,
        out_shape=jax.ShapeDtypeStruct((D, n_pad), jnp.float32),
        grid=(grid_n,),
        in_specs=[
            pl.BlockSpec((1, tile_n), lambda i: (0, i)),   # tags   (lane-dense)
            pl.BlockSpec((1, tile_n), lambda i: (0, i)),   # probs  (lane-dense)
            pl.BlockSpec((D, V), lambda i: (0, 0)),        # table  (resident)
        ],
        out_specs=pl.BlockSpec((D, tile_n), lambda i: (0, i)),
        compiler_params=pltpu.CompilerParams(
            dimension_semantics=("parallel",)),
    )(tags_lane, probs_lane, table_t)

    # Undo the transposed / padded layout (pure layout plumbing in the wrapper).
    out = out_t.T[:N].reshape(B, S, D)
    return out


def init_tag_embedding_params(key, tag_size, tag_dim, padding_idx):
    """Deterministic synthetic init matching nn.Embedding(tag_size, tag_dim, padding_idx)."""
    table = jax.random.normal(key, (tag_size, tag_dim), dtype=jnp.float32)
    # nn.Embedding zeroes the padding_idx row at init.
    table = table.at[padding_idx].set(0.0)
    return table


if __name__ == "__main__":
    # Small shapes consistent with the module.
    tag_size = 16      # vocabulary of tags
    tag_dim = 32       # embedding dim
    padding_idx = 0
    B, S = 2, 8        # batch of 2 examples, 8 tags each

    key = jax.random.PRNGKey(0)
    k_table, k_tags, k_probs = jax.random.split(key, 3)

    table = init_tag_embedding_params(k_table, tag_size, tag_dim, padding_idx)
    tags = jax.random.randint(k_tags, (B, S), 0, tag_size, dtype=jnp.int32)
    probs = jax.random.uniform(k_probs, (B, S), dtype=jnp.float32)

    out = tag_embedding_forward(tags, probs, table)
    out = jax.block_until_ready(out)

    # Reference check (pure JAX): table[tags] * probs[..., None]
    ref = table[tags] * probs[..., None]
    assert out.shape == (B, S, tag_dim)
    assert jnp.allclose(out, ref, atol=1e-5, rtol=1e-5), "mismatch vs reference"

    print("KERNEL_OK")
</pallas_src>

<mosaic_0001>
module attributes {stable_mosaic.version = 11 : i64} {
  func.func @tag_embedding_kernel(%arg0: i32, %arg1: memref<1x256xi32, #tpu.memory_space<vmem>>, %arg2: memref<1x256xf32, #tpu.memory_space<vmem>>, %arg3: memref<32x16xf32, #tpu.memory_space<vmem>>, %arg4: memref<32x256xf32, #tpu.memory_space<vmem>>) attributes {dimension_semantics = [#tpu.dimension_semantics<parallel>], iteration_bounds = array<i64: 1>, scalar_prefetch = 0 : i64, scratch_operands = 0 : i64, tpu.core_type = #tpu.core_type<tc>, window_params = [{transform_indices = @transform_0, window_bounds = array<i64: 1, 256>}, {transform_indices = @transform_1, window_bounds = array<i64: 1, 256>}, {pipeline_mode = #tpu.pipeline_mode<synchronous>, transform_indices = @transform_2, window_bounds = array<i64: 32, 16>}, {transform_indices = @transform_3, window_bounds = array<i64: 32, 256>}]} {
    %c0 = arith.constant 0 : index
    %c0_0 = arith.constant 0 : index
    %0 = vector.load %arg1[%c0, %c0_0] : memref<1x256xi32, #tpu.memory_space<vmem>>, vector<1x256xi32>
    %1 = tpu.iota {dimensions = array<i32: 0>} : vector<16x256xi32>
    %2 = vector.broadcast %0 : vector<1x256xi32> to vector<16x256xi32>
    %3 = arith.cmpi eq, %1, %2 : vector<16x256xi32>
    %4 = arith.extui %3 : vector<16x256xi1> to vector<16x256xi32>
    %5 = arith.sitofp %4 : vector<16x256xi32> to vector<16x256xf32>
    %c0_1 = arith.constant 0 : index
    %c0_2 = arith.constant 0 : index
    %6 = vector.load %arg3[%c0_1, %c0_2] : memref<32x16xf32, #tpu.memory_space<vmem>>, vector<32x16xf32>
    %cst = arith.constant dense<0.000000e+00> : vector<32x256xf32>
    %7 = tpu.matmul %6, %5, %cst {dimension_numbers = #tpu.dot_dimension_numbers<[1], [0], [0], [1], [0, 0, 1, 1], [], []>} : vector<32x16xf32>, vector<16x256xf32>, vector<32x256xf32> -> vector<32x256xf32>
    %c0_3 = arith.constant 0 : index
    %c0_4 = arith.constant 0 : index
    %8 = vector.load %arg2[%c0_3, %c0_4] : memref<1x256xf32, #tpu.memory_space<vmem>>, vector<1x256xf32>
    %9 = vector.broadcast %8 : vector<1x256xf32> to vector<32x256xf32>
    %10 = arith.mulf %7, %9 : vector<32x256xf32>
    %c0_5 = arith.constant 0 : index
    %c0_6 = arith.constant 0 : index
    %11 = vector.load %arg4[%c0_5, %c0_6] : memref<32x256xf32, #tpu.memory_space<vmem>>, vector<32x256xf32>
    tpu.vector_store %arg4[%c0_5, %c0_6], %10 {strides = array<i32>} : memref<32x256xf32, #tpu.memory_space<vmem>>, vector<32x256xf32>,
    return
  }
  func.func @transform_0(%arg0: i32) -> (i32, i32) {
    %c0_i32 = arith.constant 0 : i32
    %c0_i32_0 = arith.constant 0 : i32
    return %c0_i32, %arg0 : i32, i32
  }
  func.func @transform_1(%arg0: i32) -> (i32, i32) {
    %c0_i32 = arith.constant 0 : i32
    %c0_i32_0 = arith.constant 0 : i32
    return %c0_i32, %arg0 : i32, i32
  }
  func.func @transform_2(%arg0: i32) -> (i32, i32) {
    %c0_i32 = arith.constant 0 : i32
    %c0_i32_0 = arith.constant 0 : i32
    %c0_i32_1 = arith.constant 0 : i32
    return %c0_i32, %c0_i32_0 : i32, i32
  }
  func.func @transform_3(%arg0: i32) -> (i32, i32) {
    %c0_i32 = arith.constant 0 : i32
    %c0_i32_0 = arith.constant 0 : i32
    return %c0_i32, %arg0 : i32, i32
  }
}

</mosaic_0001>

<bundles_post_ra>
// kernel: tpu_custom_call.1
= control target key start
LH: loop header
LB: loop body
LE: loop exit
PB: predicated region body
PF: predicated region fallthrough
CT: control target
= control target key end

     0   :  { %v16_v0 = vlaneseq  ;;  %v236_v2 = vmov 0.0   ;;  %s291_s0 = inlined_call_operand.vmem [shape: s32[1,256], index: 0, kind: input, shape index: {}]   ;;  %s292_s1 = inlined_call_operand.vmem [shape: f32[1,256], index: 1, kind: input, shape index: {}]   ;;  %s293_s2 = inlined_call_operand.vmem [shape: f32[32,16], index: 2, kind: input, shape index: {}]   ;;  %s294_s3 = inlined_call_operand.hbm [shape: f32[32,256], index: 3, kind: output, shape index: {}]  }
   0x1   :  { %120 = vmatprep.mubr.f32.mxu0 %v236_v2  ;;  %132 = vmatprep.mubr.f32.mxu1 %v236_v2 }
   0x2   :  { %v17_v1 = vshrl.u32 %v16_v0, 7 }
   0x3   :  { %8 = vsyncpa [#allocation3], 0  ;;  %v15_v3 = vld [vmem:[%s291_s0] sm:$0x3]  ;;  %v237_v9 = vmov 1.0|1.0  }
   0x4   :  { %v18_v4 = vadd.s32 8, %v17_v1  ;;  %v25_v5 = vsub.s32 1, %v17_v1  ;;  %v21_v6 = vsub.s32 0, %v17_v1  ;;  %v39_v10 = vld [vmem:[%s293_s2] sm:$0xff]  ;;  %vm43_vm6 = vcmask 130048   ;;  %v41_v11 = vld [vmem:[%s293_s2 + $0x10] sm:$0xff] }
   0x5   :  { %v40_v12 = vld [vmem:[%s293_s2 + $0x8] sm:$0xff]  ;;  %v42_v13 = vld [vmem:[%s293_s2 + $0x18] sm:$0xff]  ;;  %v145_v14 = vld [vmem:[%s292_s1] sm:$0x3]  ;;  %s238_s23 = smov [#allocation2]  }
   0x6   :  { %v26_v7 = vrot.slane %v15_v3, %v25_v5  ;;  %v22_v8 = vrot.slane %v15_v3, %v21_v6  ;;  %v150_v15 = vrot.slane %v145_v14, %v21_v6  ;;  %v154_v16 = vrot.slane %v145_v14, %v25_v5  ;;  %s178_s24 = sshll.u32 %s238_s23, 4  ;;  %s179_s24 = int_to_ptr.vmem [resolvable:$true] %s178_s24 }
   0x7   :  { %s212_s1 = scalar_lea.vmem %s179_s24, 1024  ;;  %p217_p1 = scmp.lt.s32.totalorder %s179_s24, %s179_s24 }
   0x8   :  { %vm28_vm0 = vcmp.eq.s32.totalorder %v17_v1, %v26_v7  ;;  %vm30_vm1 = vcmp.eq.s32.totalorder %v18_v4, %v26_v7  ;;  %vm27_vm2 = vcmp.eq.s32.totalorder %v17_v1, %v22_v8  ;;  %vm29_vm3 = vcmp.eq.s32.totalorder %v18_v4, %v22_v8  ;;  %p213_p0 = scmp.ne.s32.totalorder %s179_s24, %s212_s1  ;;  %p218_p2 = scmp.lt.s32.totalorder %s212_s1, %s212_s1 }
   0x9   :  { %vm201_vm4 = vmpackc.low %vm30_vm1, %vm28_vm0 }
   0xa   :  { %202 = vmatprep.subr.msk.bf16.mxu0 %vm201_vm4, %v237_v9  ;;  %205 = vmatprep.subr.msk.bf16.mxu1 %vm201_vm4, %v237_v9  ;;  %vm203_vm5 = vmpackc.low %vm29_vm3, %vm27_vm2  ;;  %p219_p3 = por %p218_p2, %p217_p1 }
   0xb   :  { %204 = vmatpush1.bf16.msk.msra.mxu0 %vm203_vm5, %v237_v9  ;;  %206 = vmatpush1.bf16.msk.msra.mxu1 %vm203_vm5, %v237_v9 }
   0xc   :  { %p220_p4 = pnand %p219_p3, %p213_p0 }
   0xe   :  { %197 = vmatmul.mubr.msk.f32.vlgmr.msra.gmra.mrb[0].mxu0 %vm43_vm6, %v39_v10  ;;  %199 = vmatmul.mubr.msk.f32.vlgmr.msra.gmra.mrb[0].mxu1 %vm43_vm6, %v41_v11 }
   0xf   :  { %126 = vmatprep.mubr.f32.mxu0 %v236_v2  ;;  %138 = vmatprep.mubr.f32.mxu1 %v236_v2 }
  0x12   :  { %198 = vmatmul.mubr.msk.f32.gmra.mrb[2].mxu0 %vm43_vm6, %v40_v12  ;;  %200 = vmatmul.mubr.msk.f32.gmra.mrb[2].mxu1 %vm43_vm6, %v42_v13 }
  0xe1   :  { %v122_v17 = vpop.f32.mrb[0].mxu0  ;;  %v134_v18 = vpop.f32.mrb[0].mxu1 }
  0xe2   :  { %v157_v19 = vmul.f32 %v150_v15, %v122_v17  ;;  %v161_v20 = vmul.f32 %v150_v15, %v134_v18  ;;  %v124_v21 = vpop.f32.mrb[1].mxu0  ;;  %v136_v22 = vpop.f32.mrb[1].mxu1 }
  0xe3   :  { %v158_v23 = vmul.f32 %v154_v16, %v124_v21  ;;  %v162_v24 = vmul.f32 %v154_v16, %v136_v22 }
  0xe4   :  { %165 = vst [vmem:[#allocation2] sm:$0xff] %v157_v19  ;;  %169 = vst [vmem:[#allocation2 + $0x20] sm:$0xff] %v161_v20 }
  0xe5   :  { %166 = vst [vmem:[#allocation2 + $0x8] sm:$0xff] %v158_v23  ;;  %170 = vst [vmem:[#allocation2 + $0x28] sm:$0xff] %v162_v24  ;;  %v128_v25 = vpop.f32.mrb[2].mxu0  ;;  %v140_v26 = vpop.f32.mrb[2].mxu1 }
  0xe6   :  { %v159_v27 = vmul.f32 %v150_v15, %v128_v25  ;;  %v163_v28 = vmul.f32 %v150_v15, %v140_v26  ;;  %v130_v29 = vpop.f32.mrb[3].mxu0  ;;  %v142_v30 = vpop.f32.mrb[3].mxu1 }
  0xe7   :  { %v160_v31 = vmul.f32 %v154_v16, %v130_v29  ;;  %v164_v32 = vmul.f32 %v154_v16, %v142_v30 }
  0xe8   :  { %167 = vst [vmem:[#allocation2 + $0x10] sm:$0xff] %v159_v27  ;;  %171 = vst [vmem:[#allocation2 + $0x30] sm:$0xff] %v163_v28 }
  0xe9   :  { %168 = vst [vmem:[#allocation2 + $0x18] sm:$0xff] %v160_v31  ;;  %172 = vst [vmem:[#allocation2 + $0x38] sm:$0xff] %v164_v32 }
  0xea   :  { %223 = shalt.err (!%p220_p4)
}
  0xeb   :  { %s224_s26 = scalar_lea.hbm %s294_s3, 1024 }
  0xec   :  { %p225_p5 = scmp.ne.s32.totalorder %s294_s3, %s224_s26  ;;  %p228_p6 = scmp.lt.u32.totalorder %s224_s26, %s294_s3 }
  0xee   :  { %p230_p7 = pnand %p228_p6, %p225_p5 }
  0xf0   :  { %233 = shalt.err (!%p230_p7)
}
  0xf1   :  { %s239_s4 = smov 256   ;;  %s240_s5 = smov 16  }
  0xf2   :  { %184 = dma.vmem_to_hbm [thread:$0]  %s179_s24, 1024, %s294_s3, [#allocation3], %s239_s4, %s239_s4, %s240_s5  }
  0xf3   :  { %234 = dma.done.wait [#allocation3], 1024  }
  0xf4   :  { %235 = vsyncadd [#allocation3], 4294966272 }
  0xf5   :  { %188 = vsyncpa [#allocation3], 1 }

</bundles_post_ra>
